<compile_context>
chip_gen: v7x
topology: tpu7x:2x2x1
jax: 0.10.0
libtpu: 0.0.40
codegen_flags: <defaults>
</compile_context>

<pallas_src>
import functools

import jax
import jax.numpy as jnp
import numpy as np
from jax.experimental import pallas as pl
from jax.experimental.pallas import tpu as pltpu


def _focal_loss_kernel(logits_ref, targets_ref, alpha_ref, out_ref, acc_ref, *,
                       gamma: float, inv_n: float, total_n: int,
                       block_n: int, blocks_per_split: int):
    j = pl.program_id(1)                                    # row-block axis (reduction)

    @pl.when(j == 0)
    def _():
        acc_ref[...] = jnp.zeros_like(acc_ref)

    logits = logits_ref[...].astype(jnp.float32)            # (bn, C)
    tgt = targets_ref[...]                                   # (bn, 1) int32
    alpha = alpha_ref[...]                                    # (1, C) float32 (pre-cast)

    bn, c = logits.shape
    class_idx = jax.lax.broadcasted_iota(jnp.int32, (bn, c), 1)
    hit = class_idx == tgt                                    # (bn, C) bool, built once

    # numerically-stable log-sum-exp -> per-sample cross entropy
    m = jnp.max(logits, axis=-1, keepdims=True)               # (bn, 1)
    lse = m + jnp.log(jnp.sum(jnp.exp(logits - m), axis=-1, keepdims=True))
    logit_t = jnp.sum(jnp.where(hit, logits, 0.0), axis=-1, keepdims=True)
    alpha_t = jnp.sum(jnp.where(hit, alpha, 0.0), axis=-1, keepdims=True)

    ce = lse - logit_t                                         # (bn, 1)
    pt = jnp.exp(-ce)
    one_minus_pt = 1.0 - pt

    # integer-gamma fast path: VPU multiplies instead of exp/log pow on the EUP
    g = float(gamma)
    if g == 0.0:
        modulator = jnp.ones_like(one_minus_pt)
    elif g == round(g) and 0 < int(round(g)) <= 8:
        p = int(round(g))
        modulator = one_minus_pt
        for _ in range(p - 1):
            modulator = modulator * one_minus_pt
    else:
        modulator = one_minus_pt ** g

    focal = alpha_t * modulator * ce                           # (bn, 1)

    # mask rows beyond the true N (tail tile / duplicated clamped tiles)
    row0 = (pl.program_id(0) * blocks_per_split + j) * block_n
    rows = row0 + jax.lax.broadcasted_iota(jnp.int32, (bn, 1), 0)
    focal = jnp.where(rows < total_n, focal, 0.0)

    acc_ref[...] += focal                                      # VPU-only per step

    @pl.when(j == pl.num_programs(1) - 1)
    def _():
        # single reduce + scalar write per split
        out_ref[0, 0] = jnp.sum(acc_ref[...]) * inv_n


def _as_alpha_array(alpha, num_classes):
    # Mirror the PyTorch module's alpha handling (scalar -> [a, 1-a]).
    if isinstance(alpha, (float, int)) and not isinstance(alpha, bool):
        a = jnp.asarray([float(alpha), 1.0 - float(alpha)], dtype=jnp.float32)
    else:
        a = jnp.asarray(alpha, dtype=jnp.float32)
    a = a.reshape(-1)
    assert a.shape[0] == num_classes, "alpha must have one weight per class"
    return a


def _default_num_splits():
    # Use both TensorCores on v7x; single-TC generations get a size-1 axis.
    try:
        kind = jax.devices()[0].device_kind.lower()
    except Exception:
        return 1
    return 2 if "v7" in kind else 1


def _choose_block_rows(n, c, tile_bytes=4 << 20, max_rows=2048):
    rows = max(8, min(max_rows, tile_bytes // max(1, 4 * c)))
    rows = max(8, (rows // 8) * 8)
    return n if n <= rows else rows


def focal_loss(logits, targets, alpha, gamma=2.0, *,
               block_rows=None, num_splits=None):
    """logits: (N, C) float; targets: (N,) int; alpha: (C,) weights / scalar."""
    n, c = logits.shape
    alpha_2d = _as_alpha_array(alpha, c).reshape(1, c)
    targets_2d = targets.reshape(n, 1).astype(jnp.int32)
    # TODO(synk): targets could be passed lane-dense (1, N-tile) to avoid the
    # 128x lane padding of the (block_n, 1) VMEM block on very tight VMEM.

    block_n = block_rows if block_rows is not None else _choose_block_rows(n, c)
    block_n = min(int(block_n), n)
    if block_n < n and block_n % 8 != 0:
        block_n = max(8, (block_n // 8) * 8)

    total_blocks = int(pl.cdiv(n, block_n))
    splits = num_splits if num_splits is not None else _default_num_splits()
    splits = max(1, min(int(splits), total_blocks))
    blocks_per_split = int(pl.cdiv(total_blocks, splits))

    def row_block(ci, j):
        # clamp so duplicated trailing steps never DMA out of bounds
        return (jnp.minimum(ci * blocks_per_split + j, total_blocks - 1), 0)

    kernel = functools.partial(
        _focal_loss_kernel, gamma=float(gamma), inv_n=1.0 / float(n),
        total_n=n, block_n=block_n, blocks_per_split=blocks_per_split)

    # rough VMEM estimate: double-buffered logits + lane-padded targets + acc
    est = (2 * block_n * c * 4) + (2 * block_n * 128 * 4) + (block_n * 128 * 4) + (8 * c * 4)
    vmem_limit = int(min(max(2 * est + (4 << 20), 16 << 20), 48 << 20))

    partials = pl.pallas_call(
        kernel,
        out_shape=jax.ShapeDtypeStruct((splits, 1), jnp.float32),
        grid=(splits, blocks_per_split),
        in_specs=[
            pl.BlockSpec((block_n, c), row_block),
            pl.BlockSpec((block_n, 1), row_block),
            pl.BlockSpec((1, c), lambda ci, j: (0, 0)),
        ],
        out_specs=pl.BlockSpec((1, 1), lambda ci, j: (ci, 0),
                               memory_space=pltpu.MemorySpace.SMEM),
        scratch_shapes=[pltpu.VMEM((block_n, 1), jnp.float32)],
        compiler_params=pltpu.CompilerParams(
            dimension_semantics=("parallel", "arbitrary"),
            vmem_limit_bytes=vmem_limit),
    )(logits, targets_2d, alpha_2d)

    return jnp.sum(partials)


def focal_loss_ref(logits, targets, alpha, gamma=2.0):
    logp = jax.nn.log_softmax(logits.astype(jnp.float32), axis=-1)
    ce = -jnp.take_along_axis(logp, targets[:, None].astype(jnp.int32), axis=-1)[:, 0]
    pt = jnp.exp(-ce)
    return jnp.mean(alpha[targets] * (1.0 - pt) ** gamma * ce)


if __name__ == "__main__":
    key = jax.random.PRNGKey(0)

    # --- test 1: canonical small shape, default tiling, gamma=2 (int fast path)
    N, C = 16, 8
    k1, k2, key = jax.random.split(key, 3)
    logits = jax.random.normal(k1, (N, C), dtype=jnp.float32)
    targets = jax.random.randint(k2, (N,), 0, C, dtype=jnp.int32)
    alpha = jnp.asarray([0.25, 0.5, 0.75, 1.0, 0.25, 0.5, 0.75, 1.0],
                        dtype=jnp.float32)

    loss = jax.block_until_ready(focal_loss(logits, targets, alpha, gamma=2.0))
    ref = focal_loss_ref(logits, targets, alpha, gamma=2.0)
    np.testing.assert_allclose(np.asarray(loss), np.asarray(ref),
                               rtol=1e-5, atol=1e-6)

    # --- test 2: N not a multiple of the tile -> multi-step grid + tail mask,
    #             gamma=0 branch
    N2, C2 = 20, 8
    k1, k2, key = jax.random.split(key, 3)
    logits2 = jax.random.normal(k1, (N2, C2), dtype=jnp.float32)
    targets2 = jax.random.randint(k2, (N2,), 0, C2, dtype=jnp.int32)
    alpha2 = jnp.linspace(0.2, 1.0, C2, dtype=jnp.float32)

    loss2 = jax.block_until_ready(
        focal_loss(logits2, targets2, alpha2, gamma=0.0,
                   block_rows=8, num_splits=1))
    ref2 = focal_loss_ref(logits2, targets2, alpha2, gamma=0.0)
    np.testing.assert_allclose(np.asarray(loss2), np.asarray(ref2),
                               rtol=1e-5, atol=1e-6)

    # --- test 3: 2-way split grid (per-split partial sums, reduced in wrapper;
    #             serial but correct on 1-TC chips), non-integer gamma path
    N3, C3 = 40, 8
    k1, k2, key = jax.random.split(key, 3)
    logits3 = jax.random.normal(k1, (N3, C3), dtype=jnp.float32)
    targets3 = jax.random.randint(k2, (N3,), 0, C3, dtype=jnp.int32)
    alpha3 = jnp.linspace(0.1, 0.9, C3, dtype=jnp.float32)

    loss3 = jax.block_until_ready(
        focal_loss(logits3, targets3, alpha3, gamma=1.5,
                   block_rows=8, num_splits=2))
    ref3 = focal_loss_ref(logits3, targets3, alpha3, gamma=1.5)
    np.testing.assert_allclose(np.asarray(loss3), np.asarray(ref3),
                               rtol=1e-5, atol=1e-6)

    print("KERNEL_OK")
</pallas_src>

<mosaic_0001>
module attributes {stable_mosaic.version = 11 : i64} {
  func.func @_focal_loss_kernel(%arg0: i32, %arg1: i32, %arg2: memref<16x8xf32, #tpu.memory_space<vmem>>, %arg3: memref<16x1xi32, #tpu.memory_space<vmem>>, %arg4: memref<1x8xf32, #tpu.memory_space<vmem>>, %arg5: memref<1x1xf32, #tpu.memory_space<smem>>, %arg6: memref<16x1xf32, #tpu.memory_space<vmem>>) attributes {dimension_semantics = [#tpu.dimension_semantics<parallel>, #tpu.dimension_semantics<arbitrary>], iteration_bounds = array<i64: 1, 1>, scalar_prefetch = 0 : i64, scratch_operands = 1 : i64, tpu.core_type = #tpu.core_type<tc>, window_params = [{transform_indices = @transform_0, window_bounds = array<i64: 16, 8>}, {transform_indices = @transform_1, window_bounds = array<i64: 16, 1>}, {pipeline_mode = #tpu.pipeline_mode<synchronous>, transform_indices = @transform_2, window_bounds = array<i64: 1, 8>}, {transform_indices = @transform_3, window_bounds = array<i64: 1, 1>}]} {
    %c0_i32 = arith.constant 0 : i32
    %0 = arith.cmpi eq, %arg1, %c0_i32 : i32
    %1 = arith.extui %0 : i1 to i32
    %c0_i32_0 = arith.constant 0 : i32
    %2 = arith.cmpi ne, %1, %c0_i32_0 : i32
    scf.if %2 {
      %cst_21 = arith.constant 0.000000e+00 : f32
      %53 = vector.broadcast %cst_21 : f32 to vector<16x1xf32>
      %c0_22 = arith.constant 0 : index
      %c0_23 = arith.constant 0 : index
      %54 = vector.load %arg6[%c0_22, %c0_23] : memref<16x1xf32, #tpu.memory_space<vmem>>, vector<16x1xf32>
      tpu.vector_store %arg6[%c0_22, %c0_23], %53 {strides = array<i32>} : memref<16x1xf32, #tpu.memory_space<vmem>>, vector<16x1xf32>,
    } else {
    }
    %c0 = arith.constant 0 : index
    %c0_1 = arith.constant 0 : index
    %3 = vector.load %arg2[%c0, %c0_1] : memref<16x8xf32, #tpu.memory_space<vmem>>, vector<16x8xf32>
    %c0_2 = arith.constant 0 : index
    %c0_3 = arith.constant 0 : index
    %4 = vector.load %arg3[%c0_2, %c0_3] : memref<16x1xi32, #tpu.memory_space<vmem>>, vector<16x1xi32>
    %c0_4 = arith.constant 0 : index
    %c0_5 = arith.constant 0 : index
    %5 = vector.load %arg4[%c0_4, %c0_5] : memref<1x8xf32, #tpu.memory_space<vmem>>, vector<1x8xf32>
    %6 = tpu.iota {dimensions = array<i32: 1>} : vector<16x8xi32>
    %7 = vector.broadcast %4 : vector<16x1xi32> to vector<16x8xi32>
    %8 = arith.cmpi eq, %6, %7 : vector<16x8xi32>
    %cst = arith.constant dense<0xFF800000> : vector<16xf32>
    %9 = vector.multi_reduction <maximumf>, %3, %cst [1] : vector<16x8xf32> to vector<16xf32>
    %10 = vector.shape_cast %9 : vector<16xf32> to vector<16x1xf32>
    %11 = vector.broadcast %10 : vector<16x1xf32> to vector<16x8xf32>
    %12 = arith.subf %3, %11 : vector<16x8xf32>
    %13 = math.exp %12 : vector<16x8xf32>
    %cst_6 = arith.constant dense<0.000000e+00> : vector<16xf32>
    %14 = vector.multi_reduction <add>, %13, %cst_6 [1] : vector<16x8xf32> to vector<16xf32>
    %15 = vector.shape_cast %14 : vector<16xf32> to vector<16x1xf32>
    %16 = math.log %15 : vector<16x1xf32>
    %17 = arith.addf %10, %16 : vector<16x1xf32>
    %cst_7 = arith.constant 0.000000e+00 : f32
    %18 = vector.broadcast %cst_7 : f32 to vector<16x8xf32>
    %19 = arith.select %8, %3, %18 : vector<16x8xi1>, vector<16x8xf32>
    %cst_8 = arith.constant dense<0.000000e+00> : vector<16xf32>
    %20 = vector.multi_reduction <add>, %19, %cst_8 [1] : vector<16x8xf32> to vector<16xf32>
    %21 = vector.shape_cast %20 : vector<16xf32> to vector<16x1xf32>
    %cst_9 = arith.constant 0.000000e+00 : f32
    %22 = vector.shape_cast %5 : vector<1x8xf32> to vector<1x8xf32>
    %23 = vector.broadcast %22 : vector<1x8xf32> to vector<16x8xf32>
    %24 = vector.broadcast %cst_9 : f32 to vector<16x8xf32>
    %25 = arith.select %8, %23, %24 : vector<16x8xi1>, vector<16x8xf32>
    %cst_10 = arith.constant dense<0.000000e+00> : vector<16xf32>
    %26 = vector.multi_reduction <add>, %25, %cst_10 [1] : vector<16x8xf32> to vector<16xf32>
    %27 = vector.shape_cast %26 : vector<16xf32> to vector<16x1xf32>
    %28 = arith.subf %17, %21 : vector<16x1xf32>
    %cst_11 = arith.constant 0.000000e+00 : f32
    %29 = vector.broadcast %cst_11 : f32 to vector<16x1xf32>
    %30 = arith.subf %29, %28 : vector<16x1xf32>
    %31 = math.exp %30 : vector<16x1xf32>
    %cst_12 = arith.constant 1.000000e+00 : f32
    %32 = vector.broadcast %cst_12 : f32 to vector<16x1xf32>
    %33 = arith.subf %32, %31 : vector<16x1xf32>
    %34 = arith.mulf %33, %33 : vector<16x1xf32>
    %35 = arith.mulf %27, %34 : vector<16x1xf32>
    %36 = arith.mulf %35, %28 : vector<16x1xf32>
    %c1_i32 = arith.constant 1 : i32
    %37 = arith.muli %arg0, %c1_i32 : i32
    %38 = arith.addi %37, %arg1 : i32
    %c16_i32 = arith.constant 16 : i32
    %39 = arith.muli %38, %c16_i32 : i32
    %40 = tpu.iota {dimensions = array<i32: 0>} : vector<16x1xi32>
    %41 = vector.broadcast %39 : i32 to vector<16x1xi32>
    %42 = arith.addi %41, %40 : vector<16x1xi32>
    %c16_i32_13 = arith.constant 16 : i32
    %43 = vector.broadcast %c16_i32_13 : i32 to vector<16x1xi32>
    %44 = arith.cmpi slt, %42, %43 : vector<16x1xi32>
    %cst_14 = arith.constant 0.000000e+00 : f32
    %45 = vector.broadcast %cst_14 : f32 to vector<16x1xf32>
    %46 = arith.select %44, %36, %45 : vector<16x1xi1>, vector<16x1xf32>
    %c0_15 = arith.constant 0 : index
    %c0_16 = arith.constant 0 : index
    %47 = vector.load %arg6[%c0_15, %c0_16] : memref<16x1xf32, #tpu.memory_space<vmem>>, vector<16x1xf32>
    %48 = arith.addf %47, %46 : vector<16x1xf32>
    %c0_17 = arith.constant 0 : index
    %c0_18 = arith.constant 0 : index
    %49 = vector.load %arg6[%c0_17, %c0_18] : memref<16x1xf32, #tpu.memory_space<vmem>>, vector<16x1xf32>
    tpu.vector_store %arg6[%c0_17, %c0_18], %48 {strides = array<i32>} : memref<16x1xf32, #tpu.memory_space<vmem>>, vector<16x1xf32>,
    %c0_i32_19 = arith.constant 0 : i32
    %50 = arith.cmpi eq, %arg1, %c0_i32_19 : i32
    %51 = arith.extui %50 : i1 to i32
    %c0_i32_20 = arith.constant 0 : i32
    %52 = arith.cmpi ne, %51, %c0_i32_20 : i32
    scf.if %52 {
      %c0_21 = arith.constant 0 : index
      %c0_22 = arith.constant 0 : index
      %53 = vector.load %arg6[%c0_21, %c0_22] : memref<16x1xf32, #tpu.memory_space<vmem>>, vector<16x1xf32>
      %54 = vector.shape_cast %53 : vector<16x1xf32> to vector<1x16x1xf32>
      %cst_23 = arith.constant dense<0.000000e+00> : vector<1xf32>
      %55 = vector.multi_reduction <add>, %54, %cst_23 [1, 2] : vector<1x16x1xf32> to vector<1xf32>
      %56 = vector.shape_cast %55 : vector<1xf32> to vector<1x1x1xf32>
      %57 = vector.extract %56[0, 0, 0] : f32 from vector<1x1x1xf32>
      %cst_24 = arith.constant 6.250000e-02 : f32
      %58 = arith.mulf %57, %cst_24 : f32
      %c0_25 = arith.constant 0 : index
      %c0_26 = arith.constant 0 : index
      %59 = memref.load %arg5[%c0_25, %c0_26] : memref<1x1xf32, #tpu.memory_space<smem>>
      memref.store %58, %arg5[%c0_25, %c0_26] : memref<1x1xf32, #tpu.memory_space<smem>>
    } else {
    }
    return
  }
  func.func @transform_0(%arg0: i32, %arg1: i32) -> (i32, i32) {
    %c1_i32 = arith.constant 1 : i32
    %0 = arith.muli %arg0, %c1_i32 : i32
    %1 = arith.addi %0, %arg1 : i32
    %c0_i32 = arith.constant 0 : i32
    %2 = arith.minsi %1, %c0_i32 : i32
    %c0_i32_0 = arith.constant 0 : i32
    %c0_i32_1 = arith.constant 0 : i32
    return %2, %c0_i32_0 : i32, i32
  }
  func.func @transform_1(%arg0: i32, %arg1: i32) -> (i32, i32) {
    %c1_i32 = arith.constant 1 : i32
    %0 = arith.muli %arg0, %c1_i32 : i32
    %1 = arith.addi %0, %arg1 : i32
    %c0_i32 = arith.constant 0 : i32
    %2 = arith.minsi %1, %c0_i32 : i32
    %c0_i32_0 = arith.constant 0 : i32
    %c0_i32_1 = arith.constant 0 : i32
    return %2, %c0_i32_0 : i32, i32
  }
  func.func @transform_2(%arg0: i32, %arg1: i32) -> (i32, i32) {
    %c0_i32 = arith.constant 0 : i32
    %c0_i32_0 = arith.constant 0 : i32
    %c0_i32_1 = arith.constant 0 : i32
    return %c0_i32, %c0_i32_0 : i32, i32
  }
  func.func @transform_3(%arg0: i32, %arg1: i32) -> (i32, i32) {
    %c0_i32 = arith.constant 0 : i32
    %c0_i32_0 = arith.constant 0 : i32
    return %arg0, %c0_i32 : i32, i32
  }
}

</mosaic_0001>

<bundles_post_ra>
// kernel: tpu_custom_call.1
= control target key start
LH: loop header
LB: loop body
LE: loop exit
PB: predicated region body
PF: predicated region fallthrough
CT: control target
= control target key end

     0   :  { %vm101_vm0 = vcmask 64512   ;;  %v260_v4 = vmov 0   ;;  %s324_s0 = inlined_call_operand.vmem [shape: f32[16,8], index: 0, kind: input, shape index: {}]   ;;  %s325_s1 = inlined_call_operand.vmem [shape: s32[16,1], index: 1, kind: input, shape index: {}]   ;;  %s326_s2 = inlined_call_operand.vmem [shape: f32[1,8], index: 2, kind: input, shape index: {}]   ;;  %s327_s3 = inlined_call_operand.hbm [shape: f32[1,1], index: 3, kind: output, shape index: {}]  }
   0x1   :  { %v86_v0 = vld [vmem:[%s324_s0] sm:$0xff]  ;;  %v87_v1 = vld [vmem:[%s324_s0 + $0x8] sm:$0xff]  ;;  %234 = vset.pattern.permute.xlu1 %v260_v4  ;;  %235 = vset.pattern.permute.xlu0 %v260_v4 }
   0x2   :  { %v88_v2 = vld [vmem:[%s325_s1] sm:$0xff]  ;;  %v102_v3 = vsel %vm101_vm0, %v86_v0, -inf }
   0x3   :  { %8 = vsyncpa [#allocation4], 0  ;;  %103 = vmax.xlane.f32.xlu0 %v102_v3  ;;  %94 = vperm.xlu1 %234, %v88_v2   ;;  %v105_v5 = vsel %vm101_vm0, %v87_v1, -inf  ;;  %v89_v6 = vld [vmem:[%s325_s1 + $0x8] sm:$0xff]  ;;  %v91_v11 = vlaneseq  ;;  %v228_v24 = vld [vmem:[%s326_s2] ss:$0 sm:$0xff] }
   0x4   :  { %vm83_vm3 = vcmask 7168   ;;  %v261_v30 = vmov 0.0   ;;  %s248_s23 = scalar_lea.hbm %s327_s3, 16 }
   0x5   :  { %v92_v15 = vand.u32 127, %v91_v11  ;;  %84 = vst.msk [vmem:[#allocation2] sm:$0xff] %vm83_vm3, %v261_v30  ;;  %85 = vst.msk [vmem:[#allocation2 + $0x8] sm:$0xff] %vm83_vm3, %v261_v30  ;;  %p249_p0 = scmp.ne.s32.totalorder %s327_s3, %s248_s23  ;;  %p252_p1 = scmp.lt.u32.totalorder %s248_s23, %s327_s3 }
   0x7   :  { %106 = vmax.xlane.f32.xlu0 %v105_v5  ;;  %97 = vperm.xlu1 %234, %v89_v6   ;;  %p254_p2 = pnand %p252_p1, %p249_p0 }
   0xc   :  { %v176_v54 = vld [vmem:[#allocation2] sm:$0xff]  ;;  %v177_v60 = vld [vmem:[#allocation2 + $0x8] sm:$0xff] }
  0x82   :  { %v95_v14 = vpop.permute.xlu1 %94 }
  0x83   :  { %vm99_vm1 = vcmp.eq.s32.totalorder %v92_v15, %v95_v14 }
  0x84   :  { %v126_v18 = vsel %vm99_vm1, %v86_v0, 0.0  ;;  %v140_v26 = vsel %vm99_vm1, %v228_v24, 0.0 }
  0x85   :  { %v128_v20 = vsel %vm101_vm0, %v126_v18, 0.0  ;;  %v142_v27 = vsel %vm101_vm0, %v140_v26, 0.0 }
  0x86   :  { %v98_v16 = vpop.permute.xlu1 %97 }
  0x87   :  { %vm100_vm2 = vcmp.eq.s32.totalorder %v92_v15, %v98_v16 }
  0x88   :  { %v127_v22 = vsel %vm100_vm2, %v87_v1, 0.0  ;;  %v141_v28 = vsel %vm100_vm2, %v228_v24, 0.0 }
  0x89   :  { %v131_v25 = vsel %vm101_vm0, %v127_v22, 0.0  ;;  %v145_v29 = vsel %vm101_vm0, %v141_v28, 0.0 }
  0x90   :  { %v104_v7 = vpop.xlane.xlu0 %103 }
  0x91   :  { %v108_v8 = vsub.f32 %v86_v0, %v104_v7 }
  0x93   :  { %v110_v9 = vmul.f32 1.442695, %v108_v8 }
  0x94   :  { %v107_v10 = vpop.xlane.xlu0 %106 }
  0x95   :  { %236 = vpow2.f32 %v110_v9  ;;  %v109_v12 = vsub.f32 %v87_v1, %v107_v10 }
  0x97   :  { %v112_v13 = vmul.f32 1.442695, %v109_v12 }
  0x99   :  { %238 = vpow2.f32 %v112_v13 }
  0x9f   :  { %v237_v17 = vpop.eup %236 }
  0xa0   :  { %v114_v19 = vsel %vm101_vm0, %v237_v17, 0.0 }
  0xa1   :  { %115 = vadd.xlane.f32.xlu0 %v114_v19 }
  0xa3   :  { %v239_v21 = vpop.eup %238 }
  0xa4   :  { %v117_v23 = vsel %vm101_vm0, %v239_v21, 0.0 }
  0xa5   :  { %129 = vadd.xlane.f32.xlu0 %v128_v20  ;;  %118 = vadd.xlane.f32.xlu1 %v117_v23 }
  0xa9   :  { %132 = vadd.xlane.f32.xlu0 %v131_v25 }
  0xad   :  { %143 = vadd.xlane.f32.xlu0 %v142_v27 }
  0xb1   :  { %146 = vadd.xlane.f32.xlu0 %v145_v29 }
 0x12e   :  { %v116_v31 = vpop.xlane.xlu0 %115 }
 0x12f   :  { %240 = vlog2.f32 %v116_v31 }
 0x132   :  { %v119_v32 = vpop.xlane.xlu1 %118  ;;  %v130_v35 = vpop.xlane.xlu0 %129 }
 0x133   :  { %242 = vlog2.f32 %v119_v32 }
 0x136   :  { %v133_v42 = vpop.xlane.xlu0 %132 }
 0x139   :  { %v241_v33 = vpop.eup %240 }
 0x13a   :  { %v121_v34 = vmul.f32 0.6931472, %v241_v33  ;;  %v144_v49 = vpop.xlane.xlu0 %143 }
 0x13c   :  { %v124_v36 = vadd.f32 %v121_v34, %v104_v7 }
 0x13d   :  { %v243_v37 = vpop.eup %242 }
 0x13e   :  { %v123_v38 = vmul.f32 0.6931472, %v243_v37  ;;  %v148_v39 = vsub.f32 %v124_v36, %v130_v35  ;;  %v147_v57 = vpop.xlane.xlu0 %146 }
 0x140   :  { %v150_v40 = vsub.f32 0.0, %v148_v39  ;;  %v125_v41 = vadd.f32 %v123_v38, %v107_v10 }
 0x142   :  { %v152_v43 = vmul.f32 1.442695, %v150_v40  ;;  %v149_v44 = vsub.f32 %v125_v41, %v133_v42 }
 0x144   :  { %244 = vpow2.f32 %v152_v43  ;;  %v151_v45 = vsub.f32 0.0, %v149_v44 }
 0x146   :  { %v154_v46 = vmul.f32 1.442695, %v151_v45 }
 0x148   :  { %246 = vpow2.f32 %v154_v46 }
 0x14e   :  { %v245_v47 = vpop.eup %244 }
 0x14f   :  { %v156_v48 = vsub.f32 1.0, %v245_v47 }
 0x151   :  { %v158_v50 = vmul.f32 %v156_v48, %v156_v48 }
 0x152   :  { %v247_v51 = vpop.eup %246 }
 0x153   :  { %v160_v52 = vmul.f32 %v158_v50, %v144_v49  ;;  %v157_v53 = vsub.f32 1.0, %v247_v51 }
 0x155   :  { %v162_v55 = vmul.f32 %v160_v52, %v148_v39  ;;  %v159_v56 = vmul.f32 %v157_v53, %v157_v53 }
 0x157   :  { %v178_v58 = vadd.f32 %v176_v54, %v162_v55  ;;  %v161_v59 = vmul.f32 %v159_v56, %v147_v57 }
 0x159   :  { %181 = vst.msk [vmem:[#allocation2] sm:$0xff] %vm83_vm3, %v178_v58  ;;  %v163_v61 = vmul.f32 %v161_v59, %v149_v44 }
 0x15b   :  { %v179_v62 = vadd.f32 %v177_v60, %v163_v61 }
 0x15d   :  { %182 = vst.msk [vmem:[#allocation2 + $0x8] sm:$0xff] %vm83_vm3, %v179_v62 }
 0x160   :  { %v186_v63 = vld [vmem:[#allocation2] sm:$0xff] }
 0x161   :  { %v188_v1 = vsel %vm83_vm3, %v186_v63, 0.0 }
 0x164   :  { %v187_v0 = vld [vmem:[#allocation2 + $0x8] sm:$0xff] }
 0x165   :  { %v189_v2 = vsel %vm83_vm3, %v187_v0, 0.0 }
 0x166   :  { %v190_v3 = vadd.f32 %v189_v2, %v188_v1 }
 0x168   :  { %191 = vadd.xlane.f32.xlu0 %v190_v3 }
 0x1f5   :  { %v192_v4 = vpop.xlane.xlu0 %191 }
 0x1f6   :  { %v193_v5 = vrot.slane %v192_v4, 4 }
 0x1f8   :  { %v194_v6 = vadd.f32 %v193_v5, %v192_v4 }
 0x1fa   :  { %v195_v7 = vrot.slane %v194_v6, 2 }
 0x1fc   :  { %v196_v8 = vadd.f32 %v195_v7, %v194_v6 }
 0x1fe   :  { %v197_v9 = vrot.slane %v196_v8, 1 }
 0x200   :  { %v198_v10 = vadd.f32 %v197_v9, %v196_v8 }
 0x202   :  { %229 = vpush %v198_v10 }
 0x233   :  { %s230_s2 = spop %229 }
 0x234   :  { %s200_s20 = smul.f32 0.0625, %s230_s2 }
 0x236   :  { %202 = sst [smem:[#allocation3]] %s200_s20 }
 0x237   :  { %257 = shalt.err (!%p254_p2)
}
 0x238   :  { %s262_s28 = smov [#allocation3]  }
 0x239   :  { %210 = dma.smem_to_hbm %s262_s28, 16, %s327_s3, [#allocation4]  }
 0x23a   :  { %258 = dma.done.wait [#allocation4], 16  }
 0x23b   :  { %259 = vsyncadd [#allocation4], 4294967280 }
 0x23c   :  { %214 = sfence }
 0x23d   :  { %215 = vsyncpa [#allocation4], 1 }

</bundles_post_ra>
